<compile_context>
chip_gen: v5e
topology: v5e:2x2
jax: 0.10.0
libtpu: 0.0.40
codegen_flags: <defaults>
</compile_context>

<pallas_src>
import jax
import jax.numpy as jnp
from jax.experimental import pallas as pl
from jax.experimental.pallas import tpu as pltpu


def _linear_tanh_kernel(x_ref, w_ref, b_ref, o_ref):
    # x_ref: (TB, D) f32 VMEM  (streamed batch tile)
    # w_ref: (1, D)  f32 VMEM  (resident across all grid steps)
    # b_ref: (1, 1)  f32 SMEM  (scalar bias)
    # o_ref: (TB, 1) f32 VMEM
    x = x_ref[...]
    w = w_ref[...]
    # Lane-dense GEMV: VPU broadcast-multiply + XLU lane reduction
    # (avoids a 1-column MXU matmul and the (D,1) weight layout waste).
    y = jnp.sum(x * w, axis=-1, keepdims=True)
    o_ref[...] = jnp.tanh(y + b_ref[0, 0])


def neural_network_forward(x, weight, bias, *, tile_rows=None):
    """Forward pass of NeuralNetwork: tanh(x @ weight.T + bias).

    Args:
      x:      (B, D) float
      weight: (1, D) float  (PyTorch nn.Linear convention: (out_features, in_features))
      bias:   (1,)   float
    Returns:
      (B, 1) float32
    """
    B, D = x.shape
    x = x.astype(jnp.float32)
    w = weight.reshape(1, D).astype(jnp.float32)
    b = bias.reshape(1, 1).astype(jnp.float32)

    # Pick a batch tile: large enough to hit HBM roofline (>=512 rows when it
    # fits), small enough that a double-buffered x tile stays well inside the
    # VMEM budget on every TPU generation (incl. v7x's 64 MiB).
    if tile_rows is None:
        per_buffer_budget = 8 * 1024 * 1024          # bytes per x tile buffer
        tb_cap = (per_buffer_budget // (D * 4)) // 8 * 8
        tb_cap = max(8, min(1024, tb_cap))
        b_pad8 = ((B + 7) // 8) * 8                   # (8,128) sublane constraint
        TB = min(tb_cap, b_pad8)
    else:
        TB = tile_rows

    B_padded = ((B + TB - 1) // TB) * TB
    if B_padded != B:
        x = jnp.pad(x, ((0, B_padded - B), (0, 0)))   # zero rows; sliced off below

    grid = (B_padded // TB,)

    out = pl.pallas_call(
        _linear_tanh_kernel,
        out_shape=jax.ShapeDtypeStruct((B_padded, 1), jnp.float32),
        grid=grid,
        in_specs=[
            pl.BlockSpec((TB, D), lambda i: (i, 0)),            # streamed x tiles
            pl.BlockSpec((1, D), lambda i: (0, 0)),             # weight resident in VMEM
            pl.BlockSpec(memory_space=pltpu.MemorySpace.SMEM),  # scalar bias in SMEM
        ],
        out_specs=pl.BlockSpec((TB, 1), lambda i: (i, 0)),
        compiler_params=pltpu.CompilerParams(
            dimension_semantics=("parallel",),        # lets v7x split tiles across 2 TCs
            vmem_limit_bytes=48 * 1024 * 1024,
        ),
    )(x, w, b)
    return out[:B]


def init_params(key, input_dim):
    # Deterministic init mimicking PyTorch's default nn.Linear init:
    # U(-1/sqrt(fan_in), 1/sqrt(fan_in)) for both weight and bias.
    kw, kb = jax.random.split(key)
    bound = 1.0 / jnp.sqrt(jnp.float32(input_dim))
    weight = jax.random.uniform(kw, (1, input_dim), jnp.float32, -bound, bound)
    bias = jax.random.uniform(kb, (1,), jnp.float32, -bound, bound)
    return weight, bias


if __name__ == "__main__":
    key = jax.random.PRNGKey(0)
    k_x, k_x2, k_p = jax.random.split(key, 3)

    batch, input_dim = 8, 32
    x = jax.random.normal(k_x, (batch, input_dim), jnp.float32)
    weight, bias = init_params(k_p, input_dim)

    out = neural_network_forward(x, weight, bias)
    out = jax.block_until_ready(out)
    ref = jnp.tanh(x @ weight.T + bias)
    assert out.shape == (batch, 1)
    assert jnp.allclose(out, ref, atol=1e-5, rtol=1e-5)

    # Second small case exercising the padding path (B not a multiple of 8).
    batch2 = 20
    x2 = jax.random.normal(k_x2, (batch2, input_dim), jnp.float32)
    out2 = jax.block_until_ready(neural_network_forward(x2, weight, bias))
    ref2 = jnp.tanh(x2 @ weight.T + bias)
    assert out2.shape == (batch2, 1)
    assert jnp.allclose(out2, ref2, atol=1e-5, rtol=1e-5)

    print("KERNEL_OK")
</pallas_src>

<mosaic_0001>
module attributes {stable_mosaic.version = 11 : i64} {
  func.func @_linear_tanh_kernel(%arg0: i32, %arg1: memref<8x32xf32, #tpu.memory_space<vmem>>, %arg2: memref<1x32xf32, #tpu.memory_space<vmem>>, %arg3: memref<1x1xf32, #tpu.memory_space<smem>>, %arg4: memref<8x1xf32, #tpu.memory_space<vmem>>) attributes {dimension_semantics = [#tpu.dimension_semantics<parallel>], iteration_bounds = array<i64: 1>, scalar_prefetch = 0 : i64, scratch_operands = 0 : i64, tpu.core_type = #tpu.core_type<tc>, window_params = [{transform_indices = @transform_0, window_bounds = array<i64: 8, 32>}, {pipeline_mode = #tpu.pipeline_mode<synchronous>, transform_indices = @transform_1, window_bounds = array<i64: 1, 32>}, {transform_indices = @transform_2, window_bounds = array<i64: 1, 1>}, {transform_indices = @transform_3, window_bounds = array<i64: 8, 1>}]} {
    %c0 = arith.constant 0 : index
    %c0_0 = arith.constant 0 : index
    %0 = vector.load %arg1[%c0, %c0_0] : memref<8x32xf32, #tpu.memory_space<vmem>>, vector<8x32xf32>
    %c0_1 = arith.constant 0 : index
    %c0_2 = arith.constant 0 : index
    %1 = vector.load %arg2[%c0_1, %c0_2] : memref<1x32xf32, #tpu.memory_space<vmem>>, vector<1x32xf32>
    %2 = vector.broadcast %1 : vector<1x32xf32> to vector<8x32xf32>
    %3 = arith.mulf %0, %2 : vector<8x32xf32>
    %cst = arith.constant dense<0.000000e+00> : vector<8xf32>
    %4 = vector.multi_reduction <add>, %3, %cst [1] : vector<8x32xf32> to vector<8xf32>
    %5 = vector.shape_cast %4 : vector<8xf32> to vector<8x1xf32>
    %c0_3 = arith.constant 0 : index
    %c0_4 = arith.constant 0 : index
    %6 = memref.load %arg3[%c0_3, %c0_4] : memref<1x1xf32, #tpu.memory_space<smem>>
    %7 = vector.broadcast %6 : f32 to vector<8x1xf32>
    %8 = arith.addf %5, %7 : vector<8x1xf32>
    %9 = math.tanh %8 : vector<8x1xf32>
    %c0_5 = arith.constant 0 : index
    %c0_6 = arith.constant 0 : index
    %10 = vector.load %arg4[%c0_5, %c0_6] : memref<8x1xf32, #tpu.memory_space<vmem>>, vector<8x1xf32>
    tpu.vector_store %arg4[%c0_5, %c0_6], %9 {strides = array<i32>} : memref<8x1xf32, #tpu.memory_space<vmem>>, vector<8x1xf32>,
    return
  }
  func.func @transform_0(%arg0: i32) -> (i32, i32) {
    %c0_i32 = arith.constant 0 : i32
    %c0_i32_0 = arith.constant 0 : i32
    return %arg0, %c0_i32 : i32, i32
  }
  func.func @transform_1(%arg0: i32) -> (i32, i32) {
    %c0_i32 = arith.constant 0 : i32
    %c0_i32_0 = arith.constant 0 : i32
    %c0_i32_1 = arith.constant 0 : i32
    return %c0_i32, %c0_i32_0 : i32, i32
  }
  func.func @transform_2(%arg0: i32) -> (i32, i32) {
    %c0_i32 = arith.constant 0 : i32
    %c0_i32_0 = arith.constant 0 : i32
    %c0_i32_1 = arith.constant 0 : i32
    return %c0_i32, %c0_i32_0 : i32, i32
  }
  func.func @transform_3(%arg0: i32) -> (i32, i32) {
    %c0_i32 = arith.constant 0 : i32
    %c0_i32_0 = arith.constant 0 : i32
    return %arg0, %c0_i32 : i32, i32
  }
}

</mosaic_0001>

<bundles_post_ra>
// kernel: tpu_custom_call.1
= control target key start
LH: loop header
LB: loop body
LE: loop exit
PB: predicated region body
PF: predicated region fallthrough
CT: control target
= control target key end

     0   :  { %9 = vsyncpa [#allocation4], 0  ;;  %s80_s15 = smov [#allocation3]   ;;  %s113_s0 = inlined_call_operand.hbm [shape: f32[8,32], index: 0, kind: input, shape index: {}]   ;;  %s114_s1 = inlined_call_operand.vmem [shape: f32[1,32], index: 1, kind: input, shape index: {}]   ;;  %s115_s2 = inlined_call_operand.<no memory space> [shape: f32[1,1], index: 2, kind: input, shape index: {}]   ;;  %s116_s3 = inlined_call_operand.vmem [shape: f32[8,1], index: 3, kind: output, shape index: {}]  }
   0x1   :  { %s15_s14 = sshll.u32 %s113_s0, 4  ;;  %s17_s16 = sshll.u32 %s80_s15, 4  ;;  %s16_s14 = int_to_ptr.hbm [resolvable:$true] %s15_s14  ;;  %s18_s16 = int_to_ptr.vmem [resolvable:$true] %s17_s16 }
   0x2   :  { %20 = dma.hbm_to_vmem [thread:$0]  %s16_s14, 128, %s18_s16, [#allocation4]  }
   0x3   :  { %78 = dma.done.wait [#allocation4], 128  }
   0x4   :  { %79 = vsyncadd [#allocation4], 4294967168  ;;  %v29_v0 = vld [vmem:[#allocation3] sm:$0xff]  ;;  %vm35_vm0 = vcmask 261120   ;;  %v40_v4 = vstv %s115_s2  ;;  %vm43_vm1 = vcmask 7168  }
   0x5   :  { %v51_v1 = vld [vmem:[%s114_s1] ss:$0 sm:$0xff] }
   0x6   :  { %v34_v2 = vmul.f32 %v51_v1, %v29_v0 }
   0x8   :  { %v36_v3 = vsel %vm35_vm0, %v34_v2, 0.0 }
   0x9   :  { %37 = vadd.xlane.f32.xlu0 %v36_v3 }
  0x7c   :  { %v38_v5 = vpop.xlane.xlu0 %37 }
  0x7d   :  { %v41_v6 = vadd.f32 %v40_v4, %v38_v5 }
  0x7f   :  { %52 = vtanh.f32 %v41_v6 }
  0x85   :  { %v53_v7 = vpop.eup %52 }
  0x86   :  { %44 = vst.msk [vmem:[%s116_s3] sm:$0xff] %vm43_vm1, %v53_v7 }
  0x87   :  { %49 = vsyncpa [#allocation4], 1 }

</bundles_post_ra>
